<compile_context>
chip_gen: v7x
topology: tpu7x:2x2x1
jax: 0.10.0
libtpu: 0.0.40
codegen_flags: <defaults>
</compile_context>

<pallas_src>
import jax
import jax.numpy as jnp
from jax.experimental import pallas as pl
from jax.experimental.pallas import tpu as pltpu

LANES = 128  # TPU vreg lane width; all kernel slabs / the packed output are 128-lane wide


def _round_up(x, m):
    return ((x + m - 1) // m) * m


def _tiles(n):
    """Row-block (tm) / reduction-block (tk) sizes and padded extents for N nodes."""
    tm = min(256, _round_up(n, 8))      # destination-node rows per block (MXU-friendly)
    tk = min(512, _round_up(n, 128))    # source-node (reduction) extent per block
    return tm, tk, _round_up(n, tm), _round_up(n, tk)


# ----------------------------- Pallas kernel ---------------------------------
def gcn3_kernel(s_ref, xcat_ref, w1t_ref, effb_ref, x3s_ref, wfin_ref, bfin_ref,
                out_ref, acc_ref):
    k = pl.program_id(1)

    @pl.when(k == 0)
    def _():
        acc_ref[...] = jnp.zeros_like(acc_ref)

    # Reassociated layer 1: accumulate the raw-feature aggregation acc += S_blk @ Xcat_blk
    # (f32 accumulator, bf16 MXU operands).
    acc_ref[...] += jnp.dot(s_ref[...], xcat_ref[...],
                            preferred_element_type=jnp.float32)

    @pl.when(k == pl.num_programs(1) - 1)
    def _():
        # Epilogue once per row block: (S@X) @ W1^T + effb (b1 folded through S + conv
        # bias), relu; then fused lin2 via disjoint-lane add (x3 slab) + one 128x128
        # matmul; packed [middle | logits | 0] lane-dense store.
        mid = jnp.maximum(
            jnp.dot(acc_ref[...].astype(w1t_ref.dtype), w1t_ref[...],
                    preferred_element_type=jnp.float32) + effb_ref[...],
            0.0)                                            # (tm,128): middle in [0:H), 0 elsewhere
        cat = (mid + x3s_ref[...]).astype(wfin_ref.dtype)   # (tm,128) bf16
        logits = jnp.dot(cat, wfin_ref[...],
                         preferred_element_type=jnp.float32) + bfin_ref[...]
        out_ref[...] = mid + logits


def gcn3_pallas(x_cat, x3, S_pad, s_rowsum, W1, b1, conv_bias, bn_scale, bn_shift,
                W2, b2, *, matmul_dtype=jnp.bfloat16):
    N, Fin = x_cat.shape
    H = W1.shape[0]          # hidden
    F3 = x3.shape[1]
    C = W2.shape[0]          # num_class
    assert H + F3 <= LANES and H + C <= LANES
    f32 = jnp.float32

    tm, tk, Nm, Nk = _tiles(N)
    assert S_pad.shape == (Nm, Nk)
    grid = (Nm // tm, Nk // tk)

    # ---- wrapper-side algebraic folding + lane-slab packing (plain JAX glue) ----
    # fold b1 through S using its O(E) row-sum, merge with GCNConv bias -> (N,H) add term
    effb = s_rowsum[:, None] * b1[None, :] + conv_bias[None, :]
    effb_pad = jnp.zeros((Nm, LANES), f32).at[:N, :H].set(effb)
    # pad W1^T to 128 output lanes -> layer-1 result is lane-dense with zeros in [H:128)
    w1t_pad = jnp.zeros((Fin, LANES), f32).at[:, :H].set(W1.T).astype(matmul_dtype)
    # fold bn2 (eval) into lin2 and pack lin2^T into a 128x128 slab (logits at cols [H:H+C))
    W2a = W2[:, :H]                  # acts on middle
    W2b = W2[:, H:]                  # acts on bn2(x3)
    wfin = jnp.zeros((LANES, LANES), f32)
    wfin = wfin.at[:H, H:H + C].set(W2a.T)
    wfin = wfin.at[H:H + F3, H:H + C].set(W2b.T * bn_scale[:, None])   # bn2 scale folded
    wfin = wfin.astype(matmul_dtype)
    bfin = jnp.zeros((1, LANES), f32).at[0, H:H + C].set(b2 + bn_shift @ W2b.T)
    # x3 pre-placed in lanes [H:H+F3) of a zero slab (kept f32; cast once inside kernel)
    x3_slab = jnp.zeros((Nm, LANES), f32).at[:N, H:H + F3].set(x3)
    # raw concatenated node features, padded along the reduction (source-node) axis
    xcat_pad = jnp.zeros((Nk, Fin), matmul_dtype).at[:N].set(x_cat.astype(matmul_dtype))

    # TODO(synk): for production-size graphs replace the dense O(N^2) bf16 S with CSR
    # (row_ptr/col_idx/norm) passed through PrefetchScalarGridSpec and an in-kernel
    # gather/accumulate per row block; the dense S is the dominant HBM/wrapper cost.
    s_m = S_pad.astype(matmul_dtype)

    # S is the only large streamed operand; buffer it 3-deep when the reduction loop is
    # long enough to benefit (hides DMA issue latency behind the short per-tile MXU burst).
    if grid[1] >= 3:
        s_spec = pl.BlockSpec((tm, tk), lambda i, k: (i, k),
                              pipeline_mode=pl.Buffered(3))
    else:
        s_spec = pl.BlockSpec((tm, tk), lambda i, k: (i, k))

    in_specs = [
        s_spec,                                                 # S block        (tm, tk)
        pl.BlockSpec((tk, Fin), lambda i, k: (k, 0)),           # X_cat block    (tk, Fin)
        pl.BlockSpec((Fin, LANES), lambda i, k: (0, 0)),        # W1^T slab      (resident)
        pl.BlockSpec((tm, LANES), lambda i, k: (i, 0)),         # effb rows
        pl.BlockSpec((tm, LANES), lambda i, k: (i, 0)),         # x3 slab rows
        pl.BlockSpec((LANES, LANES), lambda i, k: (0, 0)),      # fused lin2 slab (resident)
        pl.BlockSpec((1, LANES), lambda i, k: (0, 0)),          # fused lin2 bias
    ]
    inputs = (s_m, xcat_pad, w1t_pad, effb_pad, x3_slab, wfin, bfin)

    flops = 2 * Nm * Nk * Fin + 2 * Nm * (Fin * LANES + LANES * LANES) + 5 * Nm * LANES
    bytes_accessed = sum(int(a.size) * a.dtype.itemsize for a in inputs) + Nm * LANES * 4

    packed = pl.pallas_call(
        gcn3_kernel,
        grid=grid,
        in_specs=in_specs,
        out_specs=pl.BlockSpec((tm, LANES), lambda i, k: (i, 0)),
        out_shape=jax.ShapeDtypeStruct((Nm, LANES), f32),
        scratch_shapes=[pltpu.VMEM((tm, Fin), jnp.float32)],    # f32 aggregation accumulator
        cost_estimate=pl.CostEstimate(flops=flops, transcendentals=0,
                                      bytes_accessed=bytes_accessed),
        compiler_params=pltpu.CompilerParams(
            dimension_semantics=("parallel", "arbitrary"),      # rows over TCs, k = reduction
            vmem_limit_bytes=32 * 1024 * 1024),                 # explicit, headroom on v7x
    )(*inputs)

    out = packed[:N, H:H + C]       # logits
    middle = packed[:N, :H]         # relu'd conv output
    return out, middle


# ------------------------- graph preprocessing (glue) ------------------------
def build_norm_adj(edge_index, edge_weight, num_nodes, norm_weight, n_pad_rows, n_pad_cols):
    """GCNConv2.norm2 (eval) + propagate aggregation pattern as a dense padded S,
    plus its O(E) row-sum (avoids a dense 4*N^2-byte reduction pass for the b1 fold)."""
    row, col = edge_index[0], edge_index[1]
    loop = jnp.arange(num_nodes, dtype=row.dtype)
    row_f = jnp.concatenate([row, loop])              # add_remaining_self_loops, fill=1
    col_f = jnp.concatenate([col, loop])
    w = jnp.concatenate([edge_weight,
                         jnp.ones((num_nodes,), jnp.float32) * norm_weight])
    deg = jnp.zeros((num_nodes,), jnp.float32).at[row_f].add(w)
    dinv = jnp.where(deg > 0, deg ** -0.5, 0.0)       # inf -> 0
    # NOTE: reference multiplies deg_inv_sqrt[row] twice (not row/col) - kept as-is.
    norm = dinv[row_f] * w * dinv[row_f]
    # aggregation index is col (edge_index[1]); message gathers x_lin[row]
    S = jnp.zeros((n_pad_rows, n_pad_cols), jnp.float32).at[col_f, row_f].add(norm)
    s_rowsum = jnp.zeros((num_nodes,), jnp.float32).at[col_f].add(norm)  # == S.sum(1)[:N]
    return S, s_rowsum


# --------------------- full forward (glue + kernel, one jit) ------------------
@jax.jit
def gcn3_apply(x, x2, x3, x5, edge_index, edge_weight,
               W1, b1, conv_bias, norm_weight, bn_scale, bn_shift, W2, b2):
    N = x.shape[0]
    # GCN3.forward preamble (eval: all dropouts are identity, node_mask=None)
    x2p = jnp.concatenate(
        [x2[:, :-1], 1.0 - jnp.sum(x2[:, :-1], axis=1, keepdims=True)], axis=1)
    x_cat = jnp.concatenate([x, x5, x2p], axis=1)     # (N, first_hidden)
    _, _, Nm, Nk = _tiles(N)
    S_pad, s_rowsum = build_norm_adj(edge_index, edge_weight, N, norm_weight, Nm, Nk)
    return gcn3_pallas(x_cat, x3, S_pad, s_rowsum, W1, b1, conv_bias,
                       bn_scale, bn_shift, W2, b2)


# ----------------------------------- main -------------------------------------
if __name__ == "__main__":
    key = jax.random.PRNGKey(0)
    N, E = 32, 64
    features_num = features_num2 = features_num3 = features_num4 = 16
    features_num5 = features_num6 = 16
    hidden, num_class = 48, 2
    first_hidden = features_num + features_num5 + features_num2   # isconvert=False -> 48

    ks = jax.random.split(key, 16)
    x = jax.random.normal(ks[0], (N, features_num), jnp.float32)
    x2 = jax.random.normal(ks[1], (N, features_num2), jnp.float32)
    x3 = jax.random.normal(ks[2], (N, features_num3), jnp.float32)
    x5 = jax.random.normal(ks[4], (N, features_num5), jnp.float32)
    # x4 / x6 exist in the reference but never reach (x, middle) with default flags; omitted.
    row = jax.random.randint(ks[6], (E,), 0, N, dtype=jnp.int32)
    col = jax.random.randint(ks[7], (E,), 0, N, dtype=jnp.int32)
    col = jnp.where(col == row, (col + 1) % N, col)   # raw edges carry no self loops
    edge_index = jnp.stack([row, col], axis=0)
    edge_weight = jnp.ones((E,), jnp.float32)         # default path: ones

    # ---- deterministic parameters (shapes from GCN3.__init__ defaults, eval mode) ----
    W1 = jax.random.normal(ks[8], (hidden, first_hidden), jnp.float32) * 0.1   # conv.first_lin
    b1 = jax.random.normal(ks[9], (hidden,), jnp.float32) * 0.1
    conv_bias = jax.random.normal(ks[10], (hidden,), jnp.float32) * 0.1        # GCNConv bias
    norm_weight = jnp.float32(1.0)   # reference randomly inits to 1.0 or 5.0; fixed to 1.0
    gamma = 1.0 + 0.1 * jax.random.normal(ks[11], (features_num3,), jnp.float32)
    beta = 0.1 * jax.random.normal(ks[12], (features_num3,), jnp.float32)
    run_mean = jnp.zeros((features_num3,), jnp.float32)
    run_var = jnp.ones((features_num3,), jnp.float32)
    bn_scale = gamma / jnp.sqrt(run_var + 1e-5)       # bn2 (eval) fused to scale/shift
    bn_shift = beta - run_mean * bn_scale
    W2 = jax.random.normal(ks[13], (num_class, hidden + features_num3), jnp.float32) * 0.1
    b2 = jax.random.normal(ks[14], (num_class,), jnp.float32) * 0.1
    # TODO(synk): bn1/bn4/bn5/bn6, lin_raw, lin3, Linear2 first_lin, embed and the converter
    # branch are constructed by the reference module but do not affect the returned
    # (x, middle) with default flags (isconvert/isx4/isx6=False, eval); omitted.

    out, middle = gcn3_apply(x, x2, x3, x5, edge_index, edge_weight,
                             W1, b1, conv_bias, norm_weight, bn_scale, bn_shift, W2, b2)
    jax.block_until_ready((out, middle))
    assert out.shape == (N, num_class) and middle.shape == (N, hidden)

    # ---------------------------- reference checks ----------------------------
    x2p = jnp.concatenate(
        [x2[:, :-1], 1.0 - jnp.sum(x2[:, :-1], axis=1, keepdims=True)], axis=1)
    x_cat = jnp.concatenate([x, x5, x2p], axis=1)
    S, s_rowsum = build_norm_adj(edge_index, edge_weight, N, norm_weight, N, N)
    W2a, W2b = W2[:, :hidden], W2[:, hidden:]

    # (a) tight: plain-JAX emulation of the exact reassociated / folded / bf16-operand math
    up = lambda a: a.astype(jnp.bfloat16).astype(jnp.float32)
    effb = s_rowsum[:, None] * b1[None, :] + conv_bias[None, :]
    agg_e = up(S) @ up(x_cat)                               # S @ X, bf16 operands, f32 acc
    mid_e = jnp.maximum(up(agg_e) @ up(W1.T) + effb, 0.0)
    cat_e = up(jnp.concatenate([mid_e, x3], axis=1))
    w2cat_t = jnp.concatenate([W2a.T, W2b.T * bn_scale[:, None]], axis=0)
    out_e = cat_e @ up(w2cat_t) + (b2 + bn_shift @ W2b.T)
    assert jnp.allclose(middle, mid_e, atol=1e-2, rtol=1e-2)
    assert jnp.allclose(out, out_e, atol=1e-2, rtol=1e-2)

    # (b) loose: faithful f32 module semantics (eval); bounds the bf16-operand error
    xlin_f = x_cat @ W1.T + b1
    mid_f = jnp.maximum(S @ xlin_f + conv_bias, 0.0)
    x3bn = x3 * bn_scale + bn_shift
    out_f = jnp.concatenate([mid_f, x3bn], axis=1) @ W2.T + b2
    assert jnp.allclose(middle, mid_f, atol=5e-2, rtol=5e-2)
    assert jnp.allclose(out, out_f, atol=5e-2, rtol=5e-2)

    print("KERNEL_OK")
</pallas_src>

<mosaic_0001>
module attributes {stable_mosaic.version = 11 : i64} {
  func.func private @main(%arg0: i32) attributes {dimension_semantics = [#tpu.dimension_semantics<core_parallel>], iteration_bounds = array<i64: 2>, tpu.core_type = #tpu.core_type<sc_scalar_subcore>, window_params = []} {
    return
  }
}

module attributes {stable_mosaic.version = 11 : i64} {
  func.func private @main(%arg0: i32) attributes {dimension_semantics = [#tpu.dimension_semantics<core_parallel>], iteration_bounds = array<i64: 2>, tpu.core_type = #tpu.core_type<sc_scalar_subcore>, window_params = []} {
    return
  }
}

module attributes {stable_mosaic.version = 11 : i64} {
  func.func @gcn3_kernel(%arg0: i32, %arg1: i32, %arg2: memref<32x128xbf16, #tpu.memory_space<vmem>>, %arg3: memref<128x48xbf16, #tpu.memory_space<vmem>>, %arg4: memref<48x128xbf16, #tpu.memory_space<vmem>>, %arg5: memref<32x128xf32, #tpu.memory_space<vmem>>, %arg6: memref<32x128xf32, #tpu.memory_space<vmem>>, %arg7: memref<128x128xbf16, #tpu.memory_space<vmem>>, %arg8: memref<1x128xf32, #tpu.memory_space<vmem>>, %arg9: memref<32x128xf32, #tpu.memory_space<vmem>>, %arg10: memref<32x48xf32, #tpu.memory_space<vmem>>) attributes {dimension_semantics = [#tpu.dimension_semantics<parallel>, #tpu.dimension_semantics<arbitrary>], iteration_bounds = array<i64: 1, 1>, scalar_prefetch = 0 : i64, scratch_operands = 1 : i64, tpu.core_type = #tpu.core_type<tc>, window_params = [{transform_indices = @transform_0, window_bounds = array<i64: 32, 128>}, {transform_indices = @transform_1, window_bounds = array<i64: 128, 48>}, {pipeline_mode = #tpu.pipeline_mode<synchronous>, transform_indices = @transform_2, window_bounds = array<i64: 48, 128>}, {transform_indices = @transform_3, window_bounds = array<i64: 32, 128>}, {transform_indices = @transform_4, window_bounds = array<i64: 32, 128>}, {pipeline_mode = #tpu.pipeline_mode<synchronous>, transform_indices = @transform_5, window_bounds = array<i64: 128, 128>}, {pipeline_mode = #tpu.pipeline_mode<synchronous>, transform_indices = @transform_6, window_bounds = array<i64: 1, 128>}, {transform_indices = @transform_7, window_bounds = array<i64: 32, 128>}]} {
    %c0_i32 = arith.constant 0 : i32
    %0 = arith.cmpi eq, %arg1, %c0_i32 : i32
    %1 = arith.extui %0 : i1 to i32
    %c0_i32_0 = arith.constant 0 : i32
    %2 = arith.cmpi ne, %1, %c0_i32_0 : i32
    scf.if %2 {
      %cst_10 = arith.constant 0.000000e+00 : f32
      %12 = vector.broadcast %cst_10 : f32 to vector<32x48xf32>
      %c0_11 = arith.constant 0 : index
      %c0_12 = arith.constant 0 : index
      %13 = vector.load %arg10[%c0_11, %c0_12] : memref<32x48xf32, #tpu.memory_space<vmem>>, vector<32x48xf32>
      tpu.vector_store %arg10[%c0_11, %c0_12], %12 {strides = array<i32>} : memref<32x48xf32, #tpu.memory_space<vmem>>, vector<32x48xf32>,
    } else {
    }
    %c0 = arith.constant 0 : index
    %c0_1 = arith.constant 0 : index
    %3 = vector.load %arg10[%c0, %c0_1] : memref<32x48xf32, #tpu.memory_space<vmem>>, vector<32x48xf32>
    %c0_2 = arith.constant 0 : index
    %c0_3 = arith.constant 0 : index
    %4 = vector.load %arg2[%c0_2, %c0_3] : memref<32x128xbf16, #tpu.memory_space<vmem>>, vector<32x128xbf16>
    %c0_4 = arith.constant 0 : index
    %c0_5 = arith.constant 0 : index
    %5 = vector.load %arg3[%c0_4, %c0_5] : memref<128x48xbf16, #tpu.memory_space<vmem>>, vector<128x48xbf16>
    %cst = arith.constant dense<0.000000e+00> : vector<32x48xf32>
    %6 = tpu.matmul %4, %5, %cst {dimension_numbers = #tpu.dot_dimension_numbers<[1], [0], [0], [1], [0, 0, 1, 1], [], []>} : vector<32x128xbf16>, vector<128x48xbf16>, vector<32x48xf32> -> vector<32x48xf32>
    %7 = arith.addf %3, %6 : vector<32x48xf32>
    %c0_6 = arith.constant 0 : index
    %c0_7 = arith.constant 0 : index
    %8 = vector.load %arg10[%c0_6, %c0_7] : memref<32x48xf32, #tpu.memory_space<vmem>>, vector<32x48xf32>
    tpu.vector_store %arg10[%c0_6, %c0_7], %7 {strides = array<i32>} : memref<32x48xf32, #tpu.memory_space<vmem>>, vector<32x48xf32>,
    %c0_i32_8 = arith.constant 0 : i32
    %9 = arith.cmpi eq, %arg1, %c0_i32_8 : i32
    %10 = arith.extui %9 : i1 to i32
    %c0_i32_9 = arith.constant 0 : i32
    %11 = arith.cmpi ne, %10, %c0_i32_9 : i32
    scf.if %11 {
      %c0_10 = arith.constant 0 : index
      %c0_11 = arith.constant 0 : index
      %12 = vector.load %arg10[%c0_10, %c0_11] : memref<32x48xf32, #tpu.memory_space<vmem>>, vector<32x48xf32>
      %13 = arith.truncf %12 : vector<32x48xf32> to vector<32x48xbf16>
      %c0_12 = arith.constant 0 : index
      %c0_13 = arith.constant 0 : index
      %14 = vector.load %arg4[%c0_12, %c0_13] : memref<48x128xbf16, #tpu.memory_space<vmem>>, vector<48x128xbf16>
      %cst_14 = arith.constant dense<0.000000e+00> : vector<32x128xf32>
      %15 = tpu.matmul %13, %14, %cst_14 {dimension_numbers = #tpu.dot_dimension_numbers<[1], [0], [0], [1], [0, 0, 1, 1], [], []>} : vector<32x48xbf16>, vector<48x128xbf16>, vector<32x128xf32> -> vector<32x128xf32>
      %c0_15 = arith.constant 0 : index
      %c0_16 = arith.constant 0 : index
      %16 = vector.load %arg5[%c0_15, %c0_16] : memref<32x128xf32, #tpu.memory_space<vmem>>, vector<32x128xf32>
      %17 = arith.addf %15, %16 : vector<32x128xf32>
      %cst_17 = arith.constant 0.000000e+00 : f32
      %18 = vector.broadcast %cst_17 : f32 to vector<32x128xf32>
      %19 = arith.maximumf %17, %18 : vector<32x128xf32>
      %c0_18 = arith.constant 0 : index
      %c0_19 = arith.constant 0 : index
      %20 = vector.load %arg6[%c0_18, %c0_19] : memref<32x128xf32, #tpu.memory_space<vmem>>, vector<32x128xf32>
      %21 = arith.addf %19, %20 : vector<32x128xf32>
      %22 = arith.truncf %21 : vector<32x128xf32> to vector<32x128xbf16>
      %c0_20 = arith.constant 0 : index
      %c0_21 = arith.constant 0 : index
      %23 = vector.load %arg7[%c0_20, %c0_21] : memref<128x128xbf16, #tpu.memory_space<vmem>>, vector<128x128xbf16>
      %cst_22 = arith.constant dense<0.000000e+00> : vector<32x128xf32>
      %24 = tpu.matmul %22, %23, %cst_22 {dimension_numbers = #tpu.dot_dimension_numbers<[1], [0], [0], [1], [0, 0, 1, 1], [], []>} : vector<32x128xbf16>, vector<128x128xbf16>, vector<32x128xf32> -> vector<32x128xf32>
      %c0_23 = arith.constant 0 : index
      %c0_24 = arith.constant 0 : index
      %25 = vector.load %arg8[%c0_23, %c0_24] : memref<1x128xf32, #tpu.memory_space<vmem>>, vector<1x128xf32>
      %26 = vector.broadcast %25 : vector<1x128xf32> to vector<32x128xf32>
      %27 = arith.addf %24, %26 : vector<32x128xf32>
      %28 = arith.addf %19, %27 : vector<32x128xf32>
      %c0_25 = arith.constant 0 : index
      %c0_26 = arith.constant 0 : index
      %29 = vector.load %arg9[%c0_25, %c0_26] : memref<32x128xf32, #tpu.memory_space<vmem>>, vector<32x128xf32>
      tpu.vector_store %arg9[%c0_25, %c0_26], %28 {strides = array<i32>} : memref<32x128xf32, #tpu.memory_space<vmem>>, vector<32x128xf32>,
    } else {
    }
    return
  }
  func.func @transform_0(%arg0: i32, %arg1: i32) -> (i32, i32) {
    %c0_i32 = arith.constant 0 : i32
    return %arg0, %arg1 : i32, i32
  }
  func.func @transform_1(%arg0: i32, %arg1: i32) -> (i32, i32) {
    %c0_i32 = arith.constant 0 : i32
    %c0_i32_0 = arith.constant 0 : i32
    return %arg1, %c0_i32 : i32, i32
  }
  func.func @transform_2(%arg0: i32, %arg1: i32) -> (i32, i32) {
    %c0_i32 = arith.constant 0 : i32
    %c0_i32_0 = arith.constant 0 : i32
    %c0_i32_1 = arith.constant 0 : i32
    return %c0_i32, %c0_i32_0 : i32, i32
  }
  func.func @transform_3(%arg0: i32, %arg1: i32) -> (i32, i32) {
    %c0_i32 = arith.constant 0 : i32
    %c0_i32_0 = arith.constant 0 : i32
    return %arg0, %c0_i32 : i32, i32
  }
  func.func @transform_4(%arg0: i32, %arg1: i32) -> (i32, i32) {
    %c0_i32 = arith.constant 0 : i32
    %c0_i32_0 = arith.constant 0 : i32
    return %arg0, %c0_i32 : i32, i32
  }
  func.func @transform_5(%arg0: i32, %arg1: i32) -> (i32, i32) {
    %c0_i32 = arith.constant 0 : i32
    %c0_i32_0 = arith.constant 0 : i32
    %c0_i32_1 = arith.constant 0 : i32
    return %c0_i32, %c0_i32_0 : i32, i32
  }
  func.func @transform_6(%arg0: i32, %arg1: i32) -> (i32, i32) {
    %c0_i32 = arith.constant 0 : i32
    %c0_i32_0 = arith.constant 0 : i32
    %c0_i32_1 = arith.constant 0 : i32
    return %c0_i32, %c0_i32_0 : i32, i32
  }
  func.func @transform_7(%arg0: i32, %arg1: i32) -> (i32, i32) {
    %c0_i32 = arith.constant 0 : i32
    %c0_i32_0 = arith.constant 0 : i32
    return %arg0, %c0_i32 : i32, i32
  }
}

</mosaic_0001>

<bundles_post_ra>
// kernel: gcn3_apply.1
= control target key start
LH: loop header
LB: loop body
LE: loop exit
PB: predicated region body
PF: predicated region fallthrough
CT: control target
= control target key end

     0   :  { %vm31_vm0 = vcmask 392192   ;;  %v537_v1 = vmov 0.0   ;;  %s690_s1 = inlined_call_operand.vmem [shape: bf16[128,48], index: 1, kind: input, shape index: {}]   ;;  %s691_s0 = inlined_call_operand.vmem [shape: bf16[32,128], index: 0, kind: input, shape index: {}]   ;;  %s692_s2 = inlined_call_operand.vmem [shape: bf16[48,128], index: 2, kind: input, shape index: {}]   ;;  %s693_s5 = inlined_call_operand.vmem [shape: bf16[128,128], index: 5, kind: input, shape index: {}]   ;;  %s694_s3 = inlined_call_operand.vmem [shape: f32[32,128], index: 3, kind: input, shape index: {}]   ;;  %s695_s4 = inlined_call_operand.vmem [shape: f32[32,128], index: 4, kind: input, shape index: {}]   ;;  %s696_s6 = inlined_call_operand.vmem [shape: f32[1,128], index: 6, kind: input, shape index: {}]   ;;  %s697_s7 = inlined_call_operand.vmem [shape: f32[32,128], index: 7, kind: output, shape index: {}]  }
   0x1   :  { %v516_v0 = vld [vmem:[%s690_s1] sm:$0xff]   ;;  %34 = vst.msk [vmem:[#allocation2 + $0x10] sm:$0xff] %vm31_vm0, %v537_v1  ;;  %32 = vst.msk [vmem:[#allocation2] sm:$0xff] %vm31_vm0, %v537_v1  ;;  %v517_v2 = vld [vmem:[%s690_s1 + $0x8] sm:$0xff]  }
   0x2   :  { %33 = vst.msk [vmem:[#allocation2 + $0x8] sm:$0xff] %vm31_vm0, %v537_v1  ;;  %35 = vst.msk [vmem:[#allocation2 + $0x18] sm:$0xff] %vm31_vm0, %v537_v1  ;;  %465 = vmatprep.subr.bf16.mxu0 %v516_v0  ;;  %v518_v3 = vld [vmem:[%s690_s1 + $0x10] sm:$0xff]   ;;  %v519_v4 = vld [vmem:[%s690_s1 + $0x18] sm:$0xff]  }
   0x3   :  { %466 = vmatpush3.bf16.msra.mxu0 %v516_v0  ;;  %v524_v5 = vld [vmem:[%s691_s0] sm:$0xff]   ;;  %v521_v7 = vld [vmem:[%s690_s1 + $0x28] sm:$0xff]   ;;  %v522_v8 = vld [vmem:[%s690_s1 + $0x30] sm:$0xff]  }
   0x4   :  { %467 = vmatprep.subr.bf16.mxu0 %v517_v2  ;;  %481 = vmatprep.mubr.bf16.mxu0 %v524_v5  ;;  %v520_v6 = vld [vmem:[%s690_s1 + $0x20] sm:$0xff]   ;;  %v523_v9 = vld [vmem:[%s690_s1 + $0x38] sm:$0xff]   ;;  %v525_v10 = vld [vmem:[%s691_s0 + $0x8] sm:$0xff]  }
   0x5   :  { %v526_v11 = vld [vmem:[%s692_s2] sm:$0xff]   ;;  %v527_v12 = vld [vmem:[%s692_s2 + $0x8] sm:$0xff]   ;;  %v528_v13 = vld [vmem:[%s692_s2 + $0x10] sm:$0xff]  }
   0x6   :  { %485 = vmatprep.subr.bf16.mxu1 %v526_v11  ;;  %v529_v14 = vld [vmem:[%s693_s5] sm:$0xff]   ;;  %v530_v33 = vld [vmem:[%s693_s5 + $0x8] sm:$0xff]   ;;  %v531_v34 = vld [vmem:[%s693_s5 + $0x10] sm:$0xff]  }
   0x7   :  { %468 = vmatpush3.bf16.msra.mxu0 %v517_v2  ;;  %486 = vmatpush3.bf16.msra.mxu1 %v526_v11  ;;  %v532_v35 = vld [vmem:[%s693_s5 + $0x18] sm:$0xff]   ;;  %v533_v36 = vld [vmem:[%s693_s5 + $0x20] sm:$0xff]   ;;  %v534_v37 = vld [vmem:[%s693_s5 + $0x28] sm:$0xff]  }
   0x8   :  { %469 = vmatprep.subr.bf16.mxu0 %v518_v3  ;;  %487 = vmatprep.subr.bf16.mxu1 %v527_v12  ;;  %v38_v15 = vld [vmem:[#allocation2 + $0x10] sm:$0xff]  ;;  %v36_v16 = vld [vmem:[#allocation2] sm:$0xff]  ;;  %v536_v39 = vld [vmem:[%s693_s5 + $0x38] sm:$0xff]  }
   0x9   :  { %v39_v18 = vld [vmem:[#allocation2 + $0x18] sm:$0xff]  ;;  %v37_v21 = vld [vmem:[#allocation2 + $0x8] sm:$0xff]  ;;  %v535_v38 = vld [vmem:[%s693_s5 + $0x30] sm:$0xff]  }
   0xa   :  { %v195_v40 = vld [vmem:[%s694_s3 + $0x10] sm:$0xff]  ;;  %v193_v41 = vld [vmem:[%s694_s3] sm:$0xff]  ;;  %v196_v43 = vld [vmem:[%s694_s3 + $0x18] sm:$0xff] }
   0xb   :  { %470 = vmatpush3.bf16.msra.mxu0 %v518_v3  ;;  %488 = vmatpush3.bf16.msra.mxu1 %v527_v12  ;;  %v194_v46 = vld [vmem:[%s694_s3 + $0x8] sm:$0xff]  ;;  %v277_v52 = vld [vmem:[%s695_s4 + $0x18] sm:$0xff]  ;;  %v274_v55 = vld [vmem:[%s695_s4] sm:$0xff] }
   0xc   :  { %471 = vmatprep.subr.bf16.mxu0 %v519_v4  ;;  %489 = vmatprep.subr.bf16.mxu1 %v528_v13  ;;  %v275_v57 = vld [vmem:[%s695_s4 + $0x8] sm:$0xff]  ;;  %v276_v58 = vld [vmem:[%s695_s4 + $0x10] sm:$0xff]  ;;  %v431_v2 = vld [vmem:[%s696_s6] ss:$0 sm:$0xff] }
   0xf   :  { %472 = vmatpush3.bf16.msra.mxu0 %v519_v4  ;;  %490 = vmatpush3.bf16.msra.mxu1 %v528_v13 }
  0x10   :  { %473 = vmatprep.subr.bf16.mxu0 %v520_v6  ;;  %495 = vmatprep.subr.bf16.mxu1 %v529_v14 }
  0x13   :  { %474 = vmatpush3.bf16.msra.mxu0 %v520_v6 }
  0x14   :  { %475 = vmatprep.subr.bf16.mxu0 %v521_v7 }
  0x17   :  { %476 = vmatpush3.bf16.msra.mxu0 %v521_v7 }
  0x18   :  { %477 = vmatprep.subr.bf16.mxu0 %v522_v8 }
  0x1b   :  { %478 = vmatpush3.bf16.msra.mxu0 %v522_v8 }
  0x1c   :  { %479 = vmatprep.subr.bf16.mxu0 %v523_v9 }
  0x1f   :  { %480 = vmatpush3.bf16.msra.mxu0 %v523_v9 }
  0x22   :  { %482 = vmatmul.mubr.bf16.vlgmr.msra.gmra.mrb[0].mxu0 %v525_v10 }
  0xf5   :  { %v483_v17 = vpop.f32.mrb[0].mxu0 }
  0xf6   :  { %v171_v19 = vadd.f32 %v483_v17, %v38_v15  ;;  %v154_v20 = vpop.f32.mrb[1].mxu0 }
  0xf7   :  { %v169_v22 = vadd.f32 %v154_v20, %v36_v16  ;;  %v484_v23 = vpop.f32.mrb[2].mxu0 }
  0xf8   :  { %176 = vst.msk [vmem:[#allocation2 + $0x10] sm:$0xff] %vm31_vm0, %v171_v19  ;;  %v172_v24 = vadd.f32 %v484_v23, %v39_v18  ;;  %v157_v25 = vpop.f32.mrb[3].mxu0 }
  0xf9   :  { %174 = vst.msk [vmem:[#allocation2] sm:$0xff] %vm31_vm0, %v169_v22  ;;  %v170_v26 = vadd.f32 %v157_v25, %v37_v21 }
  0xfa   :  { %177 = vst.msk [vmem:[#allocation2 + $0x18] sm:$0xff] %vm31_vm0, %v172_v24 }
  0xfb   :  { %175 = vst.msk [vmem:[#allocation2 + $0x8] sm:$0xff] %vm31_vm0, %v170_v26 }
  0xff   :  { %v183_v31 = vld [vmem:[#allocation2 + $0x10] sm:$0xff] }
 0x100   :  { %v181_v28 = vld [vmem:[#allocation2] sm:$0xff] }
 0x101   :  { %v184_v27 = vld [vmem:[#allocation2 + $0x18] sm:$0xff] }
 0x102   :  { %v182_v29 = vld [vmem:[#allocation2 + $0x8] sm:$0xff]  ;;  %v186_v32 = vpack.c.bf16 %v184_v27, %v183_v31 }
 0x103   :  { %v185_v30 = vpack.c.bf16 %v182_v29, %v181_v28 }
 0x105   :  { %491 = vmatprep.mubr.msk.bf16.mxu1 %vm31_vm0, %v185_v30 }
 0x106   :  { %492 = vmatmul.mubr.msk.bf16.vlgmr.msra.gmra.mrb[0].mxu1 %vm31_vm0, %v186_v32 }
 0x107   :  { %496 = vmatpush3.bf16.msra.mxu1 %v529_v14 }
 0x108   :  { %497 = vmatprep.subr.bf16.mxu1 %v530_v33 }
 0x10b   :  { %498 = vmatpush3.bf16.msra.mxu1 %v530_v33 }
 0x10c   :  { %499 = vmatprep.subr.bf16.mxu1 %v531_v34 }
 0x10f   :  { %500 = vmatpush3.bf16.msra.mxu1 %v531_v34 }
 0x110   :  { %501 = vmatprep.subr.bf16.mxu1 %v532_v35 }
 0x113   :  { %502 = vmatpush3.bf16.msra.mxu1 %v532_v35 }
 0x114   :  { %503 = vmatprep.subr.bf16.mxu1 %v533_v36 }
 0x117   :  { %504 = vmatpush3.bf16.msra.mxu1 %v533_v36 }
 0x118   :  { %505 = vmatprep.subr.bf16.mxu1 %v534_v37 }
 0x11b   :  { %506 = vmatpush3.bf16.msra.mxu1 %v534_v37 }
 0x11c   :  { %507 = vmatprep.subr.bf16.mxu1 %v535_v38 }
 0x11f   :  { %508 = vmatpush3.bf16.msra.mxu1 %v535_v38 }
 0x120   :  { %509 = vmatprep.subr.bf16.mxu1 %v536_v39 }
 0x123   :  { %510 = vmatpush3.bf16.msra.mxu1 %v536_v39 }
 0x1d9   :  { %v493_v42 = vpop.f32.mrb[0].mxu1 }
 0x1da   :  { %v264_v44 = vadd.f32 %v493_v42, %v195_v40  ;;  %v255_v45 = vpop.f32.mrb[1].mxu1 }
 0x1db   :  { %v256_v47 = vadd.f32 %v255_v45, %v193_v41  ;;  %v494_v48 = vpop.f32.mrb[2].mxu1 }
 0x1dc   :  { %v267_v49 = vadd.f32 %v494_v48, %v196_v43  ;;  %v258_v50 = vpop.f32.mrb[3].mxu1  ;;  %v272_v54 = vmax.f32 %v264_v44, 0.0 }
 0x1dd   :  { %v270_v51 = vmax.f32 %v256_v47, 0.0  ;;  %v259_v53 = vadd.f32 %v258_v50, %v194_v46 }
 0x1de   :  { %v273_v56 = vmax.f32 %v267_v49, 0.0  ;;  %v280_v63 = vadd.f32 %v276_v58, %v272_v54 }
 0x1df   :  { %v271_v59 = vmax.f32 %v259_v53, 0.0  ;;  %v278_v61 = vadd.f32 %v274_v55, %v270_v51 }
 0x1e0   :  { %v281_v60 = vadd.f32 %v277_v52, %v273_v56 }
 0x1e1   :  { %v279_v62 = vadd.f32 %v275_v57, %v271_v59 }
 0x1e2   :  { %v283_v1 = vpack.c.bf16 %v281_v60, %v280_v63 }
 0x1e3   :  { %v282_v0 = vpack.c.bf16 %v279_v62, %v278_v61 }
 0x1e5   :  { %511 = vmatprep.mubr.bf16.mxu1 %v282_v0 }
 0x1e6   :  { %512 = vmatmul.mubr.bf16.vlgmr.msra.gmra.mrb[4].mxu1 %v283_v1 }
 0x2b9   :  { %v513_v3 = vpop.f32.mrb[4].mxu1 }
 0x2ba   :  { %v398_v4 = vadd.f32 %v513_v3, %v431_v2  ;;  %v389_v5 = vpop.f32.mrb[5].mxu1 }
 0x2bb   :  { %v390_v6 = vadd.f32 %v431_v2, %v389_v5  ;;  %v514_v7 = vpop.f32.mrb[6].mxu1 }
 0x2bc   :  { %v406_v8 = vadd.f32 %v398_v4, %v272_v54  ;;  %v401_v9 = vadd.f32 %v514_v7, %v431_v2  ;;  %v392_v10 = vpop.f32.mrb[7].mxu1 }
 0x2bd   :  { %v404_v11 = vadd.f32 %v390_v6, %v270_v51  ;;  %v393_v12 = vadd.f32 %v431_v2, %v392_v10 }
 0x2be   :  { %410 = vst [vmem:[%s697_s7 + $0x10] sm:$0xff] %v406_v8  ;;  %v407_v13 = vadd.f32 %v401_v9, %v273_v56 }
 0x2bf   :  { %408 = vst [vmem:[%s697_s7] sm:$0xff] %v404_v11  ;;  %v405_v14 = vadd.f32 %v393_v12, %v271_v59 }
 0x2c0   :  { %411 = vst [vmem:[%s697_s7 + $0x18] sm:$0xff] %v407_v13 }
 0x2c1   :  { %409 = vst [vmem:[%s697_s7 + $0x8] sm:$0xff] %v405_v14 }

</bundles_post_ra>
